<compile_context>
chip_gen: v7x
topology: tpu7x:2x2x1
jax: 0.10.0
libtpu: 0.0.40
codegen_flags: <defaults>
</compile_context>

<pallas_src>
import functools

import jax
import jax.numpy as jnp
from jax.experimental import pallas as pl
from jax.experimental.pallas import tpu as pltpu


def _policy_kernel(state_ref, upper_ref, w1s_ref, w1u_ref, w2_ref, wh_ref, b_ref,
                   out_ref, *, hidden_dim, head_pad):
    # Packed biases: row 0 = b1[:H], row 1 = b2[:H], row 2 = fused head bias[:P].
    b1 = b_ref[0:1, :hidden_dim]                                   # (1, H)
    b2 = b_ref[1:2, :hidden_dim]                                   # (1, H)
    bh = b_ref[2:3, :head_pad]                                     # (1, P)

    # fc1 + relu  (concat avoided: split weight, accumulate two dots)
    h1 = jnp.dot(state_ref[...], w1s_ref[...], preferred_element_type=jnp.float32)
    h1 = h1 + jnp.dot(upper_ref[...], w1u_ref[...], preferred_element_type=jnp.float32)
    h1 = jnp.maximum(h1 + b1, 0.0)

    # fc2 + relu
    h2 = jnp.dot(h1, w2_ref[...], preferred_element_type=jnp.float32)
    h2 = jnp.maximum(h2 + b2, 0.0)

    # fused mean|value head -> lane-dense (B, P) output (columns > A are zero)
    out_ref[...] = jnp.dot(h2, wh_ref[...], preferred_element_type=jnp.float32) + bh


def pack_params(params, state_dim):
    """One-time packing of PyTorch-style params into the kernel layout."""
    H = params["w1"].shape[1]
    A = params["wm"].shape[1]
    P = ((A + 1 + 127) // 128) * 128          # lane-dense padded head width
    W = max(H, P)

    w1s = params["w1"][:state_dim, :]                              # (S, H)
    w1u = params["w1"][state_dim:, :]                              # (U, H)

    # fused head weight: cols [0:A] = mean head, col A = value head, rest zero
    wh = jnp.zeros((H, P), jnp.float32)
    wh = wh.at[:, :A].set(params["wm"])
    wh = wh.at[:, A:A + 1].set(params["wv"])

    # packed biases (3, W)
    bpack = jnp.zeros((3, W), jnp.float32)
    bpack = bpack.at[0, :H].set(params["b1"][0])
    bpack = bpack.at[1, :H].set(params["b2"][0])
    bpack = bpack.at[2, :A].set(params["bm"][0])
    bpack = bpack.at[2, A].set(params["bv"][0, 0])

    return dict(w1s=w1s, w1u=w1u, w2=params["w2"], wh=wh, bpack=bpack,
                log_std=params["log_std"],
                hidden_dim=int(H), action_dim=int(A), head_pad=int(P))


def policy_forward(state, upper_params, packed):
    """Pallas implementation of PolicyNetwork.forward -> (mean, std, value)."""
    B = state.shape[0]
    H = packed["hidden_dim"]
    A = packed["action_dim"]
    P = packed["head_pad"]

    vmem_spec = pl.BlockSpec(memory_space=pltpu.MemorySpace.VMEM)

    operands = (
        state, upper_params,
        packed["w1s"], packed["w1u"], packed["w2"], packed["wh"], packed["bpack"],
    )

    out = pl.pallas_call(
        functools.partial(_policy_kernel, hidden_dim=H, head_pad=P),
        out_shape=jax.ShapeDtypeStruct((B, P), jnp.float32),
        in_specs=[vmem_spec] * len(operands),
        out_specs=vmem_spec,
    )(*operands)

    mean = out[:, :A]                           # (B, A)
    value = out[:, A:A + 1]                     # (B, 1)
    std = jnp.exp(packed["log_std"])            # (1, A) -- parameter-only, in glue
    return mean, std, value


def init_params(key, state_dim, action_dim, upper_param_dim, hidden_dim=128):
    """Deterministic synthetic parameters (PyTorch Linear shapes, stored transposed)."""
    d_in = state_dim + upper_param_dim
    ks = jax.random.split(key, 8)

    def lin(kw, kb, fan_in, fan_out):
        bound = 1.0 / jnp.sqrt(fan_in)
        w = jax.random.uniform(kw, (fan_in, fan_out), jnp.float32, -bound, bound)
        b = jax.random.uniform(kb, (1, fan_out), jnp.float32, -bound, bound)
        return w, b

    w1, b1 = lin(ks[0], ks[1], d_in, hidden_dim)
    w2, b2 = lin(ks[2], ks[3], hidden_dim, hidden_dim)
    wm, bm = lin(ks[4], ks[5], hidden_dim, action_dim)
    wv, bv = lin(ks[6], ks[7], hidden_dim, 1)
    log_std = jnp.zeros((1, action_dim), jnp.float32)

    return dict(w1=w1, b1=b1, w2=w2, b2=b2, wm=wm, bm=bm, wv=wv, bv=bv,
                log_std=log_std)


def _reference_forward(state, upper_params, p):
    x = jnp.concatenate([state, upper_params], axis=1)
    h1 = jax.nn.relu(x @ p["w1"] + p["b1"])
    h2 = jax.nn.relu(h1 @ p["w2"] + p["b2"])
    mean = h2 @ p["wm"] + p["bm"]
    std = jnp.exp(p["log_std"])
    value = h2 @ p["wv"] + p["bv"]
    return mean, std, value


if __name__ == "__main__":
    # Small shapes consistent with the module's forward.
    B, state_dim, upper_param_dim, action_dim, hidden_dim = 8, 16, 8, 4, 32

    key = jax.random.PRNGKey(0)
    k_params, k_state, k_upper = jax.random.split(key, 3)

    params = init_params(k_params, state_dim, action_dim, upper_param_dim, hidden_dim)
    packed = pack_params(params, state_dim)     # one-time layout packing (glue)

    state = jax.random.normal(k_state, (B, state_dim), jnp.float32)
    upper = jax.random.normal(k_upper, (B, upper_param_dim), jnp.float32)

    mean, std, value = policy_forward(state, upper, packed)
    jax.block_until_ready((mean, std, value))

    # Correctness check against a pure-JAX reference on the unpacked params.
    ref_mean, ref_std, ref_value = _reference_forward(state, upper, params)
    assert mean.shape == (B, action_dim)
    assert std.shape == (1, action_dim)
    assert value.shape == (B, 1)
    assert jnp.allclose(mean, ref_mean, atol=1e-5, rtol=1e-5)
    assert jnp.allclose(std, ref_std, atol=1e-6, rtol=1e-6)
    assert jnp.allclose(value, ref_value, atol=1e-5, rtol=1e-5)

    print("KERNEL_OK")
</pallas_src>

<mosaic_0001>
module attributes {stable_mosaic.version = 11 : i64} {
  func.func @_policy_kernel(%arg0: memref<8x16xf32, #tpu.memory_space<vmem>>, %arg1: memref<8x8xf32, #tpu.memory_space<vmem>>, %arg2: memref<16x32xf32, #tpu.memory_space<vmem>>, %arg3: memref<8x32xf32, #tpu.memory_space<vmem>>, %arg4: memref<32x32xf32, #tpu.memory_space<vmem>>, %arg5: memref<32x128xf32, #tpu.memory_space<vmem>>, %arg6: memref<3x128xf32, #tpu.memory_space<vmem>>, %arg7: memref<8x128xf32, #tpu.memory_space<vmem>>) attributes {dimension_semantics = [], scalar_prefetch = 0 : i64, scratch_operands = 0 : i64, tpu.core_type = #tpu.core_type<tc>} {
    %c0 = arith.constant 0 : index
    %c0_0 = arith.constant 0 : index
    %0 = vector.load %arg6[%c0, %c0_0] : memref<3x128xf32, #tpu.memory_space<vmem>>, vector<1x32xf32>
    %c1 = arith.constant 1 : index
    %c0_1 = arith.constant 0 : index
    %1 = vector.load %arg6[%c1, %c0_1] : memref<3x128xf32, #tpu.memory_space<vmem>>, vector<1x32xf32>
    %c2 = arith.constant 2 : index
    %c0_2 = arith.constant 0 : index
    %2 = vector.load %arg6[%c2, %c0_2] : memref<3x128xf32, #tpu.memory_space<vmem>>, vector<1x128xf32>
    %c0_3 = arith.constant 0 : index
    %c0_4 = arith.constant 0 : index
    %3 = vector.load %arg0[%c0_3, %c0_4] : memref<8x16xf32, #tpu.memory_space<vmem>>, vector<8x16xf32>
    %c0_5 = arith.constant 0 : index
    %c0_6 = arith.constant 0 : index
    %4 = vector.load %arg2[%c0_5, %c0_6] : memref<16x32xf32, #tpu.memory_space<vmem>>, vector<16x32xf32>
    %cst = arith.constant dense<0.000000e+00> : vector<8x32xf32>
    %5 = tpu.matmul %3, %4, %cst {dimension_numbers = #tpu.dot_dimension_numbers<[1], [0], [0], [1], [0, 0, 1, 1], [], []>} : vector<8x16xf32>, vector<16x32xf32>, vector<8x32xf32> -> vector<8x32xf32>
    %c0_7 = arith.constant 0 : index
    %c0_8 = arith.constant 0 : index
    %6 = vector.load %arg1[%c0_7, %c0_8] : memref<8x8xf32, #tpu.memory_space<vmem>>, vector<8x8xf32>
    %c0_9 = arith.constant 0 : index
    %c0_10 = arith.constant 0 : index
    %7 = vector.load %arg3[%c0_9, %c0_10] : memref<8x32xf32, #tpu.memory_space<vmem>>, vector<8x32xf32>
    %cst_11 = arith.constant dense<0.000000e+00> : vector<8x32xf32>
    %8 = tpu.matmul %6, %7, %cst_11 {dimension_numbers = #tpu.dot_dimension_numbers<[1], [0], [0], [1], [0, 0, 1, 1], [], []>} : vector<8x8xf32>, vector<8x32xf32>, vector<8x32xf32> -> vector<8x32xf32>
    %9 = arith.addf %5, %8 : vector<8x32xf32>
    %10 = vector.broadcast %0 : vector<1x32xf32> to vector<8x32xf32>
    %11 = arith.addf %9, %10 : vector<8x32xf32>
    %cst_12 = arith.constant 0.000000e+00 : f32
    %12 = vector.broadcast %cst_12 : f32 to vector<8x32xf32>
    %13 = arith.maximumf %11, %12 : vector<8x32xf32>
    %c0_13 = arith.constant 0 : index
    %c0_14 = arith.constant 0 : index
    %14 = vector.load %arg4[%c0_13, %c0_14] : memref<32x32xf32, #tpu.memory_space<vmem>>, vector<32x32xf32>
    %cst_15 = arith.constant dense<0.000000e+00> : vector<8x32xf32>
    %15 = tpu.matmul %13, %14, %cst_15 {dimension_numbers = #tpu.dot_dimension_numbers<[1], [0], [0], [1], [0, 0, 1, 1], [], []>} : vector<8x32xf32>, vector<32x32xf32>, vector<8x32xf32> -> vector<8x32xf32>
    %16 = vector.broadcast %1 : vector<1x32xf32> to vector<8x32xf32>
    %17 = arith.addf %15, %16 : vector<8x32xf32>
    %cst_16 = arith.constant 0.000000e+00 : f32
    %18 = vector.broadcast %cst_16 : f32 to vector<8x32xf32>
    %19 = arith.maximumf %17, %18 : vector<8x32xf32>
    %c0_17 = arith.constant 0 : index
    %c0_18 = arith.constant 0 : index
    %20 = vector.load %arg5[%c0_17, %c0_18] : memref<32x128xf32, #tpu.memory_space<vmem>>, vector<32x128xf32>
    %cst_19 = arith.constant dense<0.000000e+00> : vector<8x128xf32>
    %21 = tpu.matmul %19, %20, %cst_19 {dimension_numbers = #tpu.dot_dimension_numbers<[1], [0], [0], [1], [0, 0, 1, 1], [], []>} : vector<8x32xf32>, vector<32x128xf32>, vector<8x128xf32> -> vector<8x128xf32>
    %22 = vector.broadcast %2 : vector<1x128xf32> to vector<8x128xf32>
    %23 = arith.addf %21, %22 : vector<8x128xf32>
    %c0_20 = arith.constant 0 : index
    %c0_21 = arith.constant 0 : index
    %24 = vector.load %arg7[%c0_20, %c0_21] : memref<8x128xf32, #tpu.memory_space<vmem>>, vector<8x128xf32>
    tpu.vector_store %arg7[%c0_20, %c0_21], %23 {strides = array<i32>} : memref<8x128xf32, #tpu.memory_space<vmem>>, vector<8x128xf32>,
    return
  }
}

</mosaic_0001>

<bundles_post_ra>
// kernel: tpu_custom_call.1
= control target key start
LH: loop header
LB: loop body
LE: loop exit
PB: predicated region body
PF: predicated region fallthrough
CT: control target
= control target key end

     0   :  { %12 = vsyncpa [#allocation3], 0  ;;  %s805_s0 = inlined_call_operand.hbm [shape: f32[8,16], index: 0, kind: input, shape index: {}]   ;;  %s806_s1 = inlined_call_operand.hbm [shape: f32[8,8], index: 1, kind: input, shape index: {}]   ;;  %s807_s2 = inlined_call_operand.hbm [shape: f32[16,32], index: 2, kind: input, shape index: {}]   ;;  %s808_s3 = inlined_call_operand.vmem [shape: f32[8,32], index: 3, kind: input, shape index: {}]   ;;  %s809_s4 = inlined_call_operand.hbm [shape: f32[32,32], index: 4, kind: input, shape index: {}]   ;;  %s810_s5 = inlined_call_operand.hbm [shape: f32[32,128], index: 5, kind: input, shape index: {}]   ;;  %s811_s6 = inlined_call_operand.vmem [shape: f32[3,128], index: 6, kind: input, shape index: {}]   ;;  %s812_s7 = inlined_call_operand.hbm [shape: f32[8,128], index: 7, kind: output, shape index: {}]  }
   0x1   :  { %13 = vsyncpa [#allocation6], 0 }
   0x2   :  { %14 = vsyncpa [#allocation9], 0 }
   0x3   :  { %15 = vsyncpa [#allocation4], 0  ;;  %s657_s24 = smov [#allocation5]   ;;  %s517_s28 = scalar_lea.hbm %s806_s1, 128 }
   0x4   :  { %s32_s25 = sshll.u32 %s657_s24, 4  ;;  %p518_p0 = scmp.ne.s32.totalorder %s806_s1, %s517_s28  ;;  %s33_s25 = int_to_ptr.vmem [resolvable:$true] %s32_s25 }
   0x5   :  { %p521_p1 = scmp.lt.u32.totalorder %s517_s28, %s806_s1 }
   0x7   :  { %p523_p2 = pnand %p521_p1, %p518_p0 }
   0x9   :  { %526 = shalt.err (!%p523_p2)
}
   0xa   :  { %s527_s10 = scalar_lea.vmem %s33_s25, 128  ;;  %p532_p4 = scmp.lt.s32.totalorder %s33_s25, %s33_s25 }
   0xb   :  { %p528_p3 = scmp.ne.s32.totalorder %s33_s25, %s527_s10  ;;  %p533_p5 = scmp.lt.s32.totalorder %s527_s10, %s527_s10 }
   0xd   :  { %p534_p6 = por %p533_p5, %p532_p4 }
   0xf   :  { %p535_p7 = pnand %p534_p6, %p528_p3 }
  0x11   :  { %538 = shalt.err (!%p535_p7)
}
  0x12   :  { %35 = dma.hbm_to_vmem [thread:$0]  %s806_s1, 128, %s33_s25, [#allocation6]  }
  0x13   :  { %s658_s13 = smov [#allocation8]   ;;  %s659_s15 = smov [#allocation2]  }
  0x14   :  { %s55_s14 = sshll.u32 %s658_s13, 4  ;;  %s22_s16 = sshll.u32 %s659_s15, 4  ;;  %s56_s14 = int_to_ptr.vmem [resolvable:$true] %s55_s14  ;;  %s23_s16 = int_to_ptr.vmem [resolvable:$true] %s22_s16 }
  0x15   :  { %s539_s19 = scalar_lea.hbm %s809_s4, 512 }
  0x16   :  { %p540_p8 = scmp.ne.s32.totalorder %s809_s4, %s539_s19  ;;  %p543_p9 = scmp.lt.u32.totalorder %s539_s19, %s809_s4 }
  0x18   :  { %p545_p10 = pnand %p543_p9, %p540_p8 }
  0x1a   :  { %548 = shalt.err (!%p545_p10)
}
  0x1b   :  { %s549_s1 = scalar_lea.vmem %s56_s14, 512  ;;  %p554_p12 = scmp.lt.s32.totalorder %s56_s14, %s56_s14 }
  0x1c   :  { %p550_p11 = scmp.ne.s32.totalorder %s56_s14, %s549_s1  ;;  %p555_p13 = scmp.lt.s32.totalorder %s549_s1, %s549_s1 }
  0x1e   :  { %p556_p0 = por %p555_p13, %p554_p12 }
  0x20   :  { %p557_p1 = pnand %p556_p0, %p550_p11 }
  0x22   :  { %560 = shalt.err (!%p557_p1)
}
  0x23   :  { %s660_s24 = smov 128   ;;  %s661_s25 = smov 8  }
  0x24   :  { %61 = dma.hbm_to_vmem [thread:$0]  %s809_s4, 512, %s56_s14, [#allocation9], %s660_s24, %s660_s24, %s661_s25  }
  0x25   :  { %s561_s30 = scalar_lea.hbm %s805_s0, 128 }
  0x26   :  { %p562_p2 = scmp.ne.s32.totalorder %s805_s0, %s561_s30  ;;  %p565_p3 = scmp.lt.u32.totalorder %s561_s30, %s805_s0 }
  0x28   :  { %p567_p4 = pnand %p565_p3, %p562_p2 }
  0x2a   :  { %570 = shalt.err (!%p567_p4)
}
  0x2b   :  { %s571_s12 = scalar_lea.vmem %s23_s16, 128  ;;  %p576_p6 = scmp.lt.s32.totalorder %s23_s16, %s23_s16 }
  0x2c   :  { %p572_p5 = scmp.ne.s32.totalorder %s23_s16, %s571_s12  ;;  %p577_p7 = scmp.lt.s32.totalorder %s571_s12, %s571_s12 }
  0x2e   :  { %p578_p8 = por %p577_p7, %p576_p6 }
  0x30   :  { %p579_p9 = pnand %p578_p8, %p572_p5 }
  0x32   :  { %582 = shalt.err (!%p579_p9)
}
  0x33   :  { %25 = dma.hbm_to_vmem [thread:$0]  %s805_s0, 128, %s23_s16, [#allocation3]  }
  0x34   :  { %s662_s14 = smov [#allocation7]   ;;  %s663_s17 = smov [#allocation10]  }
  0x35   :  { %s41_s15 = sshll.u32 %s662_s14, 4  ;;  %s67_s18 = sshll.u32 %s663_s17, 4  ;;  %s42_s15 = int_to_ptr.vmem [resolvable:$true] %s41_s15  ;;  %s68_s18 = int_to_ptr.vmem [resolvable:$true] %s67_s18 }
  0x36   :  { %s583_s21 = scalar_lea.hbm %s807_s2, 256 }
  0x37   :  { %p584_p10 = scmp.ne.s32.totalorder %s807_s2, %s583_s21  ;;  %p587_p11 = scmp.lt.u32.totalorder %s583_s21, %s807_s2 }
  0x39   :  { %p589_p12 = pnand %p587_p11, %p584_p10 }
  0x3b   :  { %592 = shalt.err (!%p589_p12)
}
  0x3c   :  { %s593_s0 = scalar_lea.vmem %s42_s15, 256  ;;  %p598_p0 = scmp.lt.s32.totalorder %s42_s15, %s42_s15 }
  0x3d   :  { %p594_p13 = scmp.ne.s32.totalorder %s42_s15, %s593_s0  ;;  %p599_p1 = scmp.lt.s32.totalorder %s593_s0, %s593_s0 }
  0x3f   :  { %p600_p2 = por %p599_p1, %p598_p0 }
  0x41   :  { %p601_p3 = pnand %p600_p2, %p594_p13 }
  0x43   :  { %604 = shalt.err (!%p601_p3)
}
  0x44   :  { %47 = dma.hbm_to_vmem [thread:$0]  %s807_s2, 256, %s42_s15, [#allocation6], %s660_s24, %s660_s24, %s661_s25  }
  0x45   :  { %s605_s30 = scalar_lea.hbm %s810_s5, 512 }
  0x46   :  { %p606_p4 = scmp.ne.s32.totalorder %s810_s5, %s605_s30  ;;  %p609_p5 = scmp.lt.u32.totalorder %s605_s30, %s810_s5 }
  0x48   :  { %p611_p6 = pnand %p609_p5, %p606_p4 }
  0x4a   :  { %614 = shalt.err (!%p611_p6)
}
  0x4b   :  { %s615_s12 = scalar_lea.vmem %s68_s18, 512  ;;  %p620_p8 = scmp.lt.s32.totalorder %s68_s18, %s68_s18 }
  0x4c   :  { %p616_p7 = scmp.ne.s32.totalorder %s68_s18, %s615_s12  ;;  %p621_p9 = scmp.lt.s32.totalorder %s615_s12, %s615_s12 }
  0x4e   :  { %p622_p10 = por %p621_p9, %p620_p8 }
  0x50   :  { %p623_p11 = pnand %p622_p10, %p616_p7 }
  0x52   :  { %626 = shalt.err (!%p623_p11)
}
  0x53   :  { %73 = dma.hbm_to_vmem [thread:$0]  %s810_s5, 512, %s68_s18, [#allocation9], %s660_s24, %s660_s24, %s661_s25  }
  0x54   :  { %649 = dma.done.wait [#allocation3], 128  }
  0x55   :  { %650 = vsyncadd [#allocation3], 4294967168 }
  0x56   :  { %651 = dma.done.wait [#allocation6], 384  }
  0x57   :  { %652 = vsyncadd [#allocation6], 4294966912 }
  0x58   :  { %653 = dma.done.wait [#allocation9], 1024  }
  0x59   :  { %654 = vsyncadd [#allocation9], 4294966272  ;;  %v664_v0 = vmov 0.0|0.0   ;;  %v665_v1 = vmov 0.0   ;;  %vm666_vm0 = vmmov 0   ;;  %vm99_vm1 = vcmask 64512  }
  0x5a   :  { %491 = vmatprep.subr.bf16.mxu1 %v664_v0  ;;  %457 = vmatprep.subr.mxu0 %v665_v1  ;;  %v95_v2 = vld [vmem:[#allocation7] sm:$0xff]  ;;  %v96_v3 = vld [vmem:[#allocation7 + $0x8] sm:$0xff]  ;;  %v98_v4 = vld [vmem:[%s808_s3] sm:$0xff]  ;;  %vm173_vm2 = vcmask 130048   ;;  %vm261_vm3 = vcmask 261120   ;;  %s667_s18 = smov [#allocation11]  }
  0x5b   :  { %459 = vmatprep.mubr.msk.f32.mxu0 %vm666_vm0, %v665_v1  ;;  %466 = vmatprep.mubr.msk.f32.mxu1 %vm666_vm0, %v665_v1  ;;  %v492_v5 = vpack.c.bf16 %v96_v3, %v95_v2  ;;  %v97_v6 = vld [vmem:[#allocation5] sm:$0xff]  ;;  %v94_v7 = vld [vmem:[#allocation2] sm:$0xff]  ;;  %v255_v11 = vld [vmem:[#allocation8 + $0x10] sm:$0xff]  ;;  %s424_s19 = sshll.u32 %s667_s18, 4  ;;  %s425_s19 = int_to_ptr.vmem [resolvable:$true] %s424_s19 }
  0x5c   :  { %458 = vmatpush3.msra.mxu0 %v98_v4  ;;  %v253_v8 = vld [vmem:[#allocation8] sm:$0xff]  ;;  %v254_v9 = vld [vmem:[#allocation8 + $0x8] sm:$0xff]  ;;  %v256_v12 = vld [vmem:[#allocation8 + $0x18] sm:$0xff]  ;;  %s627_s20 = scalar_lea.vmem %s425_s19, 128  ;;  %p632_p13 = scmp.lt.s32.totalorder %s425_s19, %s425_s19 }
  0x5d   :  { %460 = vmatmul.mubr.msk.f32.vlgmr.msra.gmra.mrb[0].mxu0 %vm99_vm1, %v97_v6  ;;  %494 = vmatprep.subr.bf16.mxu0 %v664_v0  ;;  %v495_v10 = vpack.c.bf16 %v254_v9, %v253_v8  ;;  %v498_v13 = vpack.c.bf16 %v256_v12, %v255_v11  ;;  %v336_v14 = vld [vmem:[#allocation10] sm:$0xff]  ;;  %v337_v15 = vld [vmem:[#allocation10 + $0x8] sm:$0xff]  ;;  %v338_v25 = vld [vmem:[#allocation10 + $0x10] sm:$0xff]  ;;  %p628_p12 = scmp.ne.s32.totalorder %s425_s19, %s627_s20  ;;  %p633_p0 = scmp.lt.s32.totalorder %s627_s20, %s627_s20 }
  0x5e   :  { %493 = vmatpush3.bf16.msra.mxu1 %v492_v5  ;;  %477 = vmatprep.mubr.msk.f32.mxu0 %vm666_vm0, %v665_v1  ;;  %v501_v16 = vpack.c.bf16 %v337_v15, %v336_v14  ;;  %v437_v19 = vld [vmem:[%s811_s6] ss:$0 sm:$0xff]  ;;  %v339_v26 = vld [vmem:[#allocation10 + $0x18] sm:$0xff]  ;;  %v438_v28 = vld [vmem:[%s811_s6 + $0x1] ss:$0 sm:$0xff] }
  0x5f   :  { %500 = vmatprep.subr.bf16.mxu1 %v664_v0  ;;  %496 = vmatpush3.bf16.msra.mxu0 %v495_v10  ;;  %v504_v27 = vpack.c.bf16 %v339_v26, %v338_v25  ;;  %v440_v33 = vld [vmem:[%s811_s6 + $0x2] ss:$0 sm:$0xff]  ;;  %p634_p1 = por %p633_p0, %p632_p13 }
  0x60   :  { %497 = vmatprep.subr.bf16.mxu0 %v664_v0 }
  0x61   :  { %467 = vmatmul.mubr.msk.f32.vlgmr.msra.gmra.mrb[0].mxu1 %vm173_vm2, %v94_v7  ;;  %p635_p2 = pnand %p634_p1, %p628_p12 }
  0x62   :  { %488 = vmatprep.mubr.msk.f32.mxu1 %vm666_vm0, %v665_v1  ;;  %502 = vmatpush3.bf16.msra.mxu1 %v501_v16 }
  0x63   :  { %499 = vmatpush3.bf16.msra.mxu0 %v498_v13  ;;  %503 = vmatprep.subr.bf16.mxu1 %v664_v0 }
  0x66   :  { %505 = vmatpush3.bf16.msra.mxu1 %v504_v27 }
 0x130   :  { %v169_v17 = vpop.f32.mrb[0].mxu0 }
 0x131   :  { %v461_v18 = vpop.f32.mrb[1].mxu0 }
 0x134   :  { %v243_v20 = vpop.f32.mrb[0].mxu1 }
 0x135   :  { %v244_v21 = vadd.f32 %v243_v20, %v169_v17  ;;  %v468_v22 = vpop.f32.mrb[1].mxu1 }
 0x137   :  { %v251_v23 = vadd.f32 %v437_v19, %v244_v21 }
 0x139   :  { %v252_v24 = vmax.f32 %v251_v23, 0.0 }
 0x13b   :  { %478 = vmatmul.mubr.msk.f32.vlgmr.msra.gmra.mrb[2].mxu0 %vm261_vm3, %v252_v24 }
 0x20e   :  { %v331_v29 = vpop.f32.mrb[2].mxu0 }
 0x20f   :  { %v332_v30 = vadd.f32 %v438_v28, %v331_v29  ;;  %v479_v31 = vpop.f32.mrb[3].mxu0 }
 0x211   :  { %v335_v32 = vmax.f32 %v332_v30, 0.0 }
 0x213   :  { %489 = vmatmul.mubr.msk.f32.vlgmr.msra.gmra.mrb[2].mxu1 %vm261_vm3, %v335_v32 }
 0x2e6   :  { %v413_v34 = vpop.f32.mrb[2].mxu1 }
 0x2e7   :  { %v414_v35 = vadd.f32 %v440_v33, %v413_v34  ;;  %v490_v36 = vpop.f32.mrb[3].mxu1 }
 0x2e9   :  { %417 = vst [vmem:[#allocation11] sm:$0xff] %v414_v35 }
 0x2ea   :  { %638 = shalt.err (!%p635_p2)
}
 0x2eb   :  { %s639_s23 = scalar_lea.hbm %s812_s7, 128 }
 0x2ec   :  { %p640_p3 = scmp.ne.s32.totalorder %s812_s7, %s639_s23  ;;  %p643_p4 = scmp.lt.u32.totalorder %s639_s23, %s812_s7 }
 0x2ee   :  { %p645_p5 = pnand %p643_p4, %p640_p3 }
 0x2f0   :  { %648 = shalt.err (!%p645_p5)
}
 0x2f1   :  { %427 = dma.vmem_to_hbm [thread:$0]  %s425_s19, 128, %s812_s7, [#allocation4]  }
 0x2f2   :  { %655 = dma.done.wait [#allocation4], 128  }
 0x2f3   :  { %656 = vsyncadd [#allocation4], 4294967168 }
 0x2f4   :  { %431 = vsyncpa [#allocation3], 1 }
 0x2f5   :  { %432 = vsyncpa [#allocation6], 1 }
 0x2f6   :  { %433 = vsyncpa [#allocation9], 1 }
 0x2f7   :  { %434 = vsyncpa [#allocation4], 1 }

</bundles_post_ra>
